<compile_context>
chip_gen: v6e
topology: v6e:2x2x1
jax: 0.10.0
libtpu: 0.0.40
codegen_flags: <defaults>
</compile_context>

<pallas_src>
import jax
import jax.numpy as jnp
from jax.experimental import pallas as pl
from jax.experimental.pallas import tpu as pltpu


def _round_up(a, b):
    return ((a + b - 1) // b) * b


def _trojan_kernel(thrd_ref,                      # SMEM (1,1) f32 threshold
                   x_ref,                         # (TILE_N, nfeat)      f32 row tile
                   w1_ref, b1_ref,                # (nfeat, hid) bf16, (1, hid) f32
                   wcat_ref, bcat_ref,            # (hid, PW) bf16, (1, PW) f32  == [Wf | We | 0]
                   mask_ref,                      # (1, PW) f32  edge-column mask
                   out_ref):                      # (TILE_N, PW) bf16  == [feat | edge | 0]
    # Hidden Linear + ReLU.  x is cast to bf16 in-register (no extra HBM pass);
    # MXU accumulates in f32; bias add / ReLU stay f32.
    x = x_ref[...].astype(jnp.bfloat16)
    h = jnp.dot(x, w1_ref[...], preferred_element_type=jnp.float32)
    h = jnp.maximum(h + b1_ref[...], 0.0)

    # Fused feat+edge heads: one lane-dense MXU matmul against [Wf | We | 0].
    heads = jnp.dot(h.astype(jnp.bfloat16), wcat_ref[...],
                    preferred_element_type=jnp.float32) + bcat_ref[...]

    # GradWhere forward on the edge columns only (precomputed resident mask).
    thrd = thrd_ref[0, 0]
    hard = jnp.where(heads > thrd, 1.0, 0.0)
    out_ref[...] = jnp.where(mask_ref[...] != 0.0, hard, heads).astype(out_ref.dtype)


def pack_params(params):
    """One-time packing of the module weights.  Call once, reuse every forward.

    * Pads the hidden dim to a multiple of 128 (full-lane MXU tiles); padded
      hidden units see zero weight and zero bias so ReLU keeps them at 0 and
      they contribute nothing to the heads.
    * Fuses feat/edge heads into a single lane-dense [Wf | We | 0] weight.
    * Pre-casts matmul operands to bf16 and precomputes the edge-column mask.
    """
    w1, b1 = params["w1"], params["b1"]
    wf, bf = params["wf"], params["bf"]
    we, be = params["we"], params["be"]

    nfeat_in, nfeat_hidden = w1.shape
    n_feat_out = wf.shape[1]
    n_edge = we.shape[1]
    width = n_feat_out + n_edge
    pad_width = _round_up(width, 128)          # lane-dense output slab
    hid = _round_up(nfeat_hidden, 128)         # lane-dense hidden dim

    w1_p = jnp.zeros((nfeat_in, hid), jnp.float32).at[:, :nfeat_hidden].set(w1)
    b1_p = jnp.zeros((1, hid), jnp.float32).at[:, :nfeat_hidden].set(b1)

    w_cat = jnp.zeros((hid, pad_width), jnp.float32)
    w_cat = w_cat.at[:nfeat_hidden, :n_feat_out].set(wf)
    w_cat = w_cat.at[:nfeat_hidden, n_feat_out:width].set(we)
    b_cat = jnp.zeros((1, pad_width), jnp.float32)
    b_cat = b_cat.at[:, :n_feat_out].set(bf).at[:, n_feat_out:width].set(be)

    col = jnp.arange(pad_width)[None, :]
    edge_mask = ((col >= n_feat_out) & (col < width)).astype(jnp.float32)

    return {
        "w1": w1_p.astype(jnp.bfloat16),
        "b1": b1_p,
        "w_cat": w_cat.astype(jnp.bfloat16),
        "b_cat": b_cat,
        "edge_mask": edge_mask,
        "n_feat_out": n_feat_out,
        "n_edge": n_edge,
    }


def graph_trojan_forward(x, thrd, packed, *, tile_n=512):
    """x: (N, nfeat) f32, thrd: float / 0-d, packed: output of pack_params."""
    n, nfeat = x.shape
    w1_b, b1 = packed["w1"], packed["b1"]
    w_cat_b, b_cat = packed["w_cat"], packed["b_cat"]
    edge_mask = packed["edge_mask"]
    n_feat_out, n_edge = packed["n_feat_out"], packed["n_edge"]
    width = n_feat_out + n_edge
    hid = w1_b.shape[1]
    pad_width = w_cat_b.shape[1]
    assert w1_b.shape[0] == nfeat

    # Row tiling: keep at least two row tiles when possible (so both v7x
    # TensorCores get work); tile_n a multiple of 16 (bf16 sublane packing of
    # the output slab).
    tile_n = min(tile_n, max(16, _round_up(_round_up(n, 16) // 2, 16)))
    n_pad = _round_up(n, tile_n)
    x_p = x if n_pad == n else jnp.pad(x, ((0, n_pad - n), (0, 0)))

    thrd_arr = jnp.full((1, 1), thrd, dtype=jnp.float32)

    # Explicit VMEM budget: double-buffered x/out tiles + single-buffered
    # resident weights + h intermediate, with headroom.
    vmem_bytes = (
        2 * tile_n * nfeat * 4                     # x row tiles (f32, 2 bufs)
        + 2 * tile_n * pad_width * 2               # out row tiles (bf16, 2 bufs)
        + nfeat * hid * 2 + hid * 4                # W1 (bf16) + b1 (f32), 1 buf
        + hid * pad_width * 2 + 2 * pad_width * 4  # W_cat (bf16) + b_cat + mask
        + tile_n * hid * 4                         # h intermediate (f32)
    )
    vmem_limit = min(max(2 * vmem_bytes + (2 << 20), 32 << 20), 96 << 20)

    resident = dict(pipeline_mode=pl.Buffered(1))  # grid-invariant: single-buffer

    out = pl.pallas_call(
        _trojan_kernel,
        out_shape=jax.ShapeDtypeStruct((n_pad, pad_width), jnp.bfloat16),
        grid_spec=pltpu.PrefetchScalarGridSpec(
            num_scalar_prefetch=0,
            grid=(n_pad // tile_n,),
            in_specs=[
                pl.BlockSpec(memory_space=pltpu.MemorySpace.SMEM),            # thrd scalar
                pl.BlockSpec((tile_n, nfeat), lambda i: (i, 0)),              # x row tile
                pl.BlockSpec((nfeat, hid), lambda i: (0, 0), **resident),     # W1
                pl.BlockSpec((1, hid), lambda i: (0, 0), **resident),         # b1
                pl.BlockSpec((hid, pad_width), lambda i: (0, 0), **resident), # W_cat
                pl.BlockSpec((1, pad_width), lambda i: (0, 0), **resident),   # b_cat
                pl.BlockSpec((1, pad_width), lambda i: (0, 0), **resident),   # edge mask
            ],
            out_specs=pl.BlockSpec((tile_n, pad_width), lambda i: (i, 0)),
        ),
        compiler_params=pltpu.CompilerParams(
            dimension_semantics=("parallel",),
            vmem_limit_bytes=int(vmem_limit),
        ),
    )(thrd_arr, x_p, w1_b, b1, w_cat_b, b_cat, edge_mask)

    feat = out[:n, :n_feat_out].astype(jnp.float32)
    edge = out[:n, n_feat_out:width].astype(jnp.float32)
    return feat, edge


def init_params(key, nfeat, nout, nout_feat):
    """Deterministic init mirroring nn.Linear default (uniform ±1/sqrt(fan_in))."""
    n_edge = (nout * (nout - 1)) // 2
    ks = jax.random.split(key, 6)
    bound = 1.0 / (nfeat ** 0.5)

    def u(k, shape):
        return jax.random.uniform(k, shape, jnp.float32, -bound, bound)

    return {
        "w1": u(ks[0], (nfeat, nfeat)),
        "b1": u(ks[1], (1, nfeat)),
        "wf": u(ks[2], (nfeat, nout * nout_feat)),
        "bf": u(ks[3], (1, nout * nout_feat)),
        "we": u(ks[4], (nfeat, n_edge)),
        "be": u(ks[5], (1, n_edge)),
    }


if __name__ == "__main__":
    # Small-but-gridded shapes consistent with the module's forward.
    N = 512         # number of graph nodes (rows of `input`) -> grid of 2 row tiles
    NFEAT = 32      # nfeat
    NOUT = 4        # nout      -> edge head width = nout*(nout-1)/2 = 6
    NOUT_FEAT = 8   # nout_feat -> feat head width = 32
    THRD = 0.0

    key = jax.random.PRNGKey(0)
    k_x, k_p = jax.random.split(key)
    x = jax.random.normal(k_x, (N, NFEAT), dtype=jnp.float32)
    params = init_params(k_p, NFEAT, NOUT, NOUT_FEAT)

    packed = pack_params(params)          # one-time packing, reused across calls
    jax.block_until_ready(packed["w1"])

    feat, edge_weight = graph_trojan_forward(x, THRD, packed)
    jax.block_until_ready((feat, edge_weight))

    # Plain-JAX f32 reference (same math as the PyTorch module).
    h_ref = jnp.maximum(x @ params["w1"] + params["b1"], 0.0)
    feat_ref = h_ref @ params["wf"] + params["bf"]
    edge_logits_ref = h_ref @ params["we"] + params["be"]
    edge_ref = jnp.where(edge_logits_ref > THRD, 1.0, 0.0)

    assert feat.shape == (N, NOUT * NOUT_FEAT)
    assert edge_weight.shape == (N, (NOUT * (NOUT - 1)) // 2)

    # bf16 matmul operands / bf16 output slab => loose tolerance vs f32 reference.
    assert jnp.allclose(feat, feat_ref, atol=3e-2, rtol=3e-2)

    # Hard threshold must match the f32 reference except where the logit is
    # borderline (bf16 rounding may legitimately flip those), and outputs must
    # be exactly {0, 1}.
    borderline = jnp.abs(edge_logits_ref - THRD) < 5e-2
    assert bool(jnp.all((edge_weight == edge_ref) | borderline))
    assert bool(jnp.all((edge_weight == 0.0) | (edge_weight == 1.0)))

    print("KERNEL_OK")
</pallas_src>

<mosaic_0001>
module attributes {stable_mosaic.version = 11 : i64} {
  func.func @_trojan_kernel(%arg0: i32, %arg1: memref<1x1xf32, #tpu.memory_space<smem>>, %arg2: memref<256x32xf32, #tpu.memory_space<vmem>>, %arg3: memref<32x128xbf16, #tpu.memory_space<vmem>>, %arg4: memref<1x128xf32, #tpu.memory_space<vmem>>, %arg5: memref<128x128xbf16, #tpu.memory_space<vmem>>, %arg6: memref<1x128xf32, #tpu.memory_space<vmem>>, %arg7: memref<1x128xf32, #tpu.memory_space<vmem>>, %arg8: memref<256x128xbf16, #tpu.memory_space<vmem>>) attributes {dimension_semantics = [#tpu.dimension_semantics<parallel>], iteration_bounds = array<i64: 2>, scalar_prefetch = 0 : i64, scratch_operands = 0 : i64, tpu.core_type = #tpu.core_type<tc>, window_params = [{transform_indices = @transform_0, window_bounds = array<i64: 1, 1>}, {transform_indices = @transform_1, window_bounds = array<i64: 256, 32>}, {pipeline_mode = #tpu.pipeline_mode<synchronous>, transform_indices = @transform_2, window_bounds = array<i64: 32, 128>}, {pipeline_mode = #tpu.pipeline_mode<synchronous>, transform_indices = @transform_3, window_bounds = array<i64: 1, 128>}, {pipeline_mode = #tpu.pipeline_mode<synchronous>, transform_indices = @transform_4, window_bounds = array<i64: 128, 128>}, {pipeline_mode = #tpu.pipeline_mode<synchronous>, transform_indices = @transform_5, window_bounds = array<i64: 1, 128>}, {pipeline_mode = #tpu.pipeline_mode<synchronous>, transform_indices = @transform_6, window_bounds = array<i64: 1, 128>}, {transform_indices = @transform_7, window_bounds = array<i64: 256, 128>}]} {
    %c0 = arith.constant 0 : index
    %c0_0 = arith.constant 0 : index
    %0 = vector.load %arg2[%c0, %c0_0] : memref<256x32xf32, #tpu.memory_space<vmem>>, vector<256x32xf32>
    %1 = arith.truncf %0 : vector<256x32xf32> to vector<256x32xbf16>
    %c0_1 = arith.constant 0 : index
    %c0_2 = arith.constant 0 : index
    %2 = vector.load %arg3[%c0_1, %c0_2] : memref<32x128xbf16, #tpu.memory_space<vmem>>, vector<32x128xbf16>
    %cst = arith.constant dense<0.000000e+00> : vector<256x128xf32>
    %3 = tpu.matmul %1, %2, %cst {dimension_numbers = #tpu.dot_dimension_numbers<[1], [0], [0], [1], [0, 0, 1, 1], [], []>} : vector<256x32xbf16>, vector<32x128xbf16>, vector<256x128xf32> -> vector<256x128xf32>
    %c0_3 = arith.constant 0 : index
    %c0_4 = arith.constant 0 : index
    %4 = vector.load %arg4[%c0_3, %c0_4] : memref<1x128xf32, #tpu.memory_space<vmem>>, vector<1x128xf32>
    %5 = vector.broadcast %4 : vector<1x128xf32> to vector<256x128xf32>
    %6 = arith.addf %3, %5 : vector<256x128xf32>
    %cst_5 = arith.constant 0.000000e+00 : f32
    %7 = vector.broadcast %cst_5 : f32 to vector<256x128xf32>
    %8 = arith.maximumf %6, %7 : vector<256x128xf32>
    %9 = arith.truncf %8 : vector<256x128xf32> to vector<256x128xbf16>
    %c0_6 = arith.constant 0 : index
    %c0_7 = arith.constant 0 : index
    %10 = vector.load %arg5[%c0_6, %c0_7] : memref<128x128xbf16, #tpu.memory_space<vmem>>, vector<128x128xbf16>
    %cst_8 = arith.constant dense<0.000000e+00> : vector<256x128xf32>
    %11 = tpu.matmul %9, %10, %cst_8 {dimension_numbers = #tpu.dot_dimension_numbers<[1], [0], [0], [1], [0, 0, 1, 1], [], []>} : vector<256x128xbf16>, vector<128x128xbf16>, vector<256x128xf32> -> vector<256x128xf32>
    %c0_9 = arith.constant 0 : index
    %c0_10 = arith.constant 0 : index
    %12 = vector.load %arg6[%c0_9, %c0_10] : memref<1x128xf32, #tpu.memory_space<vmem>>, vector<1x128xf32>
    %13 = vector.broadcast %12 : vector<1x128xf32> to vector<256x128xf32>
    %14 = arith.addf %11, %13 : vector<256x128xf32>
    %c0_11 = arith.constant 0 : index
    %c0_12 = arith.constant 0 : index
    %15 = memref.load %arg1[%c0_11, %c0_12] : memref<1x1xf32, #tpu.memory_space<smem>>
    %16 = vector.broadcast %15 : f32 to vector<256x128xf32>
    %17 = arith.cmpf ogt, %14, %16 : vector<256x128xf32>
    %cst_13 = arith.constant 1.000000e+00 : f32
    %cst_14 = arith.constant 0.000000e+00 : f32
    %18 = vector.broadcast %cst_13 : f32 to vector<256x128xf32>
    %19 = vector.broadcast %cst_14 : f32 to vector<256x128xf32>
    %20 = arith.select %17, %18, %19 : vector<256x128xi1>, vector<256x128xf32>
    %c0_15 = arith.constant 0 : index
    %c0_16 = arith.constant 0 : index
    %21 = vector.load %arg7[%c0_15, %c0_16] : memref<1x128xf32, #tpu.memory_space<vmem>>, vector<1x128xf32>
    %cst_17 = arith.constant 0.000000e+00 : f32
    %22 = vector.broadcast %cst_17 : f32 to vector<1x128xf32>
    %23 = arith.cmpf one, %21, %22 : vector<1x128xf32>
    %24 = vector.shape_cast %23 : vector<1x128xi1> to vector<1x128xi1>
    %25 = vector.broadcast %24 : vector<1x128xi1> to vector<256x128xi1>
    %26 = arith.select %25, %20, %14 : vector<256x128xi1>, vector<256x128xf32>
    %27 = arith.truncf %26 : vector<256x128xf32> to vector<256x128xbf16>
    %c0_18 = arith.constant 0 : index
    %c0_19 = arith.constant 0 : index
    %28 = vector.load %arg8[%c0_18, %c0_19] : memref<256x128xbf16, #tpu.memory_space<vmem>>, vector<256x128xbf16>
    tpu.vector_store %arg8[%c0_18, %c0_19], %27 {strides = array<i32>} : memref<256x128xbf16, #tpu.memory_space<vmem>>, vector<256x128xbf16>,
    return
  }
  func.func @transform_0(%arg0: i32) -> (i32, i32) {
    %c0_i32 = arith.constant 0 : i32
    %c0_i32_0 = arith.constant 0 : i32
    %c0_i32_1 = arith.constant 0 : i32
    return %c0_i32, %c0_i32_0 : i32, i32
  }
  func.func @transform_1(%arg0: i32) -> (i32, i32) {
    %c0_i32 = arith.constant 0 : i32
    %c0_i32_0 = arith.constant 0 : i32
    return %arg0, %c0_i32 : i32, i32
  }
  func.func @transform_2(%arg0: i32) -> (i32, i32) {
    %c0_i32 = arith.constant 0 : i32
    %c0_i32_0 = arith.constant 0 : i32
    %c0_i32_1 = arith.constant 0 : i32
    return %c0_i32, %c0_i32_0 : i32, i32
  }
  func.func @transform_3(%arg0: i32) -> (i32, i32) {
    %c0_i32 = arith.constant 0 : i32
    %c0_i32_0 = arith.constant 0 : i32
    %c0_i32_1 = arith.constant 0 : i32
    return %c0_i32, %c0_i32_0 : i32, i32
  }
  func.func @transform_4(%arg0: i32) -> (i32, i32) {
    %c0_i32 = arith.constant 0 : i32
    %c0_i32_0 = arith.constant 0 : i32
    %c0_i32_1 = arith.constant 0 : i32
    return %c0_i32, %c0_i32_0 : i32, i32
  }
  func.func @transform_5(%arg0: i32) -> (i32, i32) {
    %c0_i32 = arith.constant 0 : i32
    %c0_i32_0 = arith.constant 0 : i32
    %c0_i32_1 = arith.constant 0 : i32
    return %c0_i32, %c0_i32_0 : i32, i32
  }
  func.func @transform_6(%arg0: i32) -> (i32, i32) {
    %c0_i32 = arith.constant 0 : i32
    %c0_i32_0 = arith.constant 0 : i32
    %c0_i32_1 = arith.constant 0 : i32
    return %c0_i32, %c0_i32_0 : i32, i32
  }
  func.func @transform_7(%arg0: i32) -> (i32, i32) {
    %c0_i32 = arith.constant 0 : i32
    %c0_i32_0 = arith.constant 0 : i32
    return %arg0, %c0_i32 : i32, i32
  }
}

</mosaic_0001>

<bundles_post_ra>
// kernel: tpu_custom_call.1
= control target key start
LH: loop header
LB: loop body
LE: loop exit
PB: predicated region body
PF: predicated region fallthrough
CT: control target
= control target key end

     0   :  { %s2104_s0 = inlined_call_operand.<no memory space> [shape: f32[1,1], index: 0, kind: input, shape index: {}]   ;;  %s2105_s1 = inlined_call_operand.vmem [shape: f32[512,32], index: 1, kind: input, shape index: {}]   ;;  %s2106_s2 = inlined_call_operand.vmem [shape: bf16[32,128], index: 2, kind: input, shape index: {}]   ;;  %s2107_s3 = inlined_call_operand.vmem [shape: f32[1,128], index: 3, kind: input, shape index: {}]   ;;  %s2108_s4 = inlined_call_operand.vmem [shape: bf16[128,128], index: 4, kind: input, shape index: {}]   ;;  %s2109_s5 = inlined_call_operand.vmem [shape: f32[1,128], index: 5, kind: input, shape index: {}]   ;;  %s2110_s6 = inlined_call_operand.vmem [shape: f32[1,128], index: 6, kind: input, shape index: {}]   ;;  %s2111_s7 = inlined_call_operand.hbm [shape: bf16[512,128], index: 7, kind: output, shape index: {}]  }
   0x1   :  { %12 = sst [smem:[#allocation2]] %s2104_s0 }
   0x2   :  { %13 = vsyncpa [#allocation4], 0 }
   0x3   :  { %15 = vsyncpa [#allocation4 + $0x1], 0  ;;  %s1690_s26 = smov 0   ;;  %s1692_s27 = smov 0  }
   0x4   :  { %s1694_s28 = smov 0   ;;  %s1696_s29 = smov 0  }
   0x5 LB: > { %s1711_s0 = sadd.s32 4294967295, %s1640_s29   ;;  %s1185_s30 = sadd.s32 4294967294, %s1640_s29   ;;  %s1640_s29 = sphi %s1696_s29, %s2117_s29   ;;  %s1636_s28 = sphi %s1694_s28, %s2116_s28   ;;  %s1632_s27 = sphi %s1692_s27, %s2115_s27   ;;  %s1628_s26 = sphi %s1690_s26, %s2114_s26  }
   0x6   : > { %s1715_s8 = sadd.s32 1, %s1640_s29   ;;  %s180_s9 = sadd.s32 1, %s1636_s28 }
   0x7   : > { %s177_s10 = ssub.s32 %s1640_s29, %s1715_s8  ;;  %p190_p0 = scmp.ne.s32.totalorder %s1636_s28, %s1632_s27 }
   0x8   : > { %p178_p1 = scmp.eq.s32.totalorder %s177_s10, 0  ;;  %p191_p2 = scmp.eq.s32.totalorder %s1711_s0, 1 }
   0x9   : > { %p196_p3 = scmp.ne.s32.totalorder %s1632_s27, %s1628_s26  ;;  %p197_p4 = scmp.eq.s32.totalorder %s1185_s30, 1 }
   0xa   : > { %s1726_s11 = scalar_select %p178_p1, %s1636_s28, %s180_s9  }
   0xb   : > { %p1728_p5 = por %p191_p2, %p190_p0  ;;  %p1732_p6 = por %p197_p4, %p196_p3 }
   0xc   : > { %p1188_p7 = scmp.ge.s32.totalorder %s1640_s29, 1  ;;  %p242_p8 = scmp.lt.s32.totalorder %s1640_s29, 3 }
   0xe   : > { %p243_p9 = pnand %p1188_p7, %p242_p8 }
   0xf   : > { %s1190_s16 = sshll.u32 (!%p243_p9), %s1711_s0, 5  ;;  %s1289_s19 = sshll.u32 (!%p243_p9), %s1711_s0, 11 }
  0x10   : > { %246 = sbr.rel (%p243_p9) target bundleno = 512 (0x200), region = 48  ;;  %p275_p10 = scmp.lt.s32.totalorder (!%p243_p9), %s1190_s16, 63 }
  0x11   : > { %s2056_s22 = scalar_lea.hbm (!%p243_p9), %s2111_s7, %s1289_s19  ;;  %s1644_s25 = smov (!%p243_p9), [#allocation3]  }
  0x15   : > { %v1570_v0 = vld [vmem:[%s2106_s2 + $0x8] sm:$0xff]   ;;  %v1571_v1 = vld [vmem:[%s2106_s2] sm:$0xff]   ;;  %v1572_v2 = vld [vmem:[%s2108_s4 + $0x38] sm:$0xff]   ;;  %s2119_s16 = smov (!%p275_p10, %s1190_s16), 63  ;;  %vm353_vm0 = vcmask 261120  }
  0x16   : > { %1427 = vmatprep.subr.bf16.mxu0 %v1570_v0  ;;  %v1573_v3 = vld [vmem:[%s2108_s4 + $0x30] sm:$0xff]   ;;  %1511 = vmatprep.subr.bf16.mxu1 %v1572_v2  ;;  %s1191_s23 = sshll.u32 %s2119_s16, 3  ;;  %v1574_v4 = vld [vmem:[%s2108_s4 + $0x28] sm:$0xff]   ;;  %v1575_v16 = vld [vmem:[%s2108_s4 + $0x20] sm:$0xff]   ;;  %s271_s16 = sand.u32 1, %s1632_s27  }
  0x17   : > { %1428 = vmatpush3.bf16.msra.mxu0 %v1570_v0  ;;  %1519 = vmatpush3.bf16.msra.mxu1 %v1572_v2  ;;  %s1754_s30 = scalar_lea.vmem %s2105_s1, %s1191_s23  ;;  %v1576_v21 = vld [vmem:[%s2108_s4 + $0x18] sm:$0xff]   ;;  %v1577_v55 = vld [vmem:[%s2108_s4 + $0x10] sm:$0xff]   ;;  %v1578_v56 = vld [vmem:[%s2108_s4 + $0x8] sm:$0xff]   ;;  %s1189_s17 = sshll.u32 %s271_s16, 7 }
  0x18   : > { %1429 = vmatprep.subr.bf16.mxu0 %v1571_v1  ;;  %1512 = vmatprep.subr.bf16.mxu1 %v1573_v3  ;;  %v282_v5 = vld [vmem:[%s1754_s30] sm:$0xff]  ;;  %v283_v6 = vld [vmem:[%s1754_s30 + $0x8] sm:$0xff]  ;;  %v284_v7 = vld [vmem:[%s1754_s30 + $0x10] sm:$0xff]  ;;  %s1898_s18 = scalar_lea.vmem [#allocation3], %s1189_s17  ;;  %s2064_s23 = scalar_lea.sflag [#allocation4], %s271_s16 }
  0x19   : > { %v314_v8 = vpack.c.bf16 %v283_v6, %v282_v5  ;;  %v285_v9 = vld [vmem:[%s1754_s30 + $0x18] sm:$0xff]  ;;  %v286_v10 = vld [vmem:[%s1754_s30 + $0x20] sm:$0xff]  ;;  %v287_v11 = vld [vmem:[%s1754_s30 + $0x28] sm:$0xff]  ;;  %s1123_s20 = sshll.u32 %s1898_s18, 4  ;;  %s2058_s20 = int_to_ptr.vmem [resolvable:$true] %s1123_s20 }
  0x1a   : > { %v315_v12 = vpack.c.bf16 %v285_v9, %v284_v7  ;;  %v316_v13 = vpack.c.bf16 %v287_v11, %v286_v10  ;;  %v288_v14 = vld [vmem:[%s1754_s30 + $0x30] sm:$0xff]  ;;  %v289_v15 = vld [vmem:[%s1754_s30 + $0x38] sm:$0xff]  ;;  %v290_v17 = vld [vmem:[%s1754_s30 + $0x40] sm:$0xff]  ;;  %s1580_s24 = scalar_lea.vmem %s2058_s20, 2048 }
  0x1b   : > { %1430 = vmatpush3.bf16.msra.mxu0 %v1571_v1  ;;  %1520 = vmatpush3.bf16.msra.mxu1 %v1573_v3  ;;  %v291_v18 = vld [vmem:[%s1754_s30 + $0x48] sm:$0xff]  ;;  %v317_v19 = vpack.c.bf16 %v289_v15, %v288_v14  ;;  %v292_v22 = vld [vmem:[%s1754_s30 + $0x50] sm:$0xff]  ;;  %v293_v23 = vld [vmem:[%s1754_s30 + $0x58] sm:$0xff]  ;;  %p1581_p11 = scmp.ne.s32.totalorder %s2058_s20, %s1580_s24 }
  0x1c   : > { %1463 = vmatprep.subr.bf16.mxu0 %v1572_v2  ;;  %1431 = vmatprep.mubr.msk.bf16.mxu0 %vm353_vm0, %v314_v8  ;;  %v318_v20 = vpack.c.bf16 %v291_v18, %v290_v17  ;;  %v294_v24 = vld [vmem:[%s1754_s30 + $0x60] sm:$0xff]  ;;  %v295_v25 = vld [vmem:[%s1754_s30 + $0x68] sm:$0xff]  ;;  %v319_v26 = vpack.c.bf16 %v293_v23, %v292_v22  ;;  %v296_v28 = vld [vmem:[%s1754_s30 + $0x70] sm:$0xff] }
  0x1d   : > { %1513 = vmatprep.subr.bf16.mxu1 %v1574_v4  ;;  %v320_v27 = vpack.c.bf16 %v295_v25, %v294_v24  ;;  %v297_v29 = vld [vmem:[%s1754_s30 + $0x78] sm:$0xff]  ;;  %v298_v30 = vld [vmem:[%s1754_s30 + $0x80] sm:$0xff]  ;;  %v299_v31 = vld [vmem:[%s1754_s30 + $0x88] sm:$0xff]  ;;  %p1582_p12 = pnand %p1581_p11, %p1728_p5 }
  0x1e   : > { %1432 = vmatmul.mubr.msk.bf16.vlgmr.msra.gmra.mxu0 %vm353_vm0, %v315_v12  ;;  %v321_v32 = vpack.c.bf16 %v297_v29, %v296_v28  ;;  %v322_v33 = vpack.c.bf16 %v299_v31, %v298_v30  ;;  %v300_v34 = vld [vmem:[%s1754_s30 + $0x90] sm:$0xff]  ;;  %v301_v35 = vld [vmem:[%s1754_s30 + $0x98] sm:$0xff]  ;;  %v302_v36 = vld [vmem:[%s1754_s30 + $0xa0] sm:$0xff] }
  0x1f   : > { %1435 = vmatprep.mubr.msk.bf16.mxu0 %vm353_vm0, %v316_v13  ;;  %1464 = vmatpush3.bf16.msra.mxu0 %v1572_v2  ;;  %v303_v37 = vld [vmem:[%s1754_s30 + $0xa8] sm:$0xff]  ;;  %v323_v38 = vpack.c.bf16 %v301_v35, %v300_v34  ;;  %v304_v40 = vld [vmem:[%s1754_s30 + $0xb0] sm:$0xff]  ;;  %v305_v41 = vld [vmem:[%s1754_s30 + $0xb8] sm:$0xff]  ;;  %p1583_p13 = pneg %p1582_p12 }
  0x20   : > { %1465 = vmatprep.subr.bf16.mxu0 %v1573_v3  ;;  %1521 = vmatpush3.bf16.msra.mxu1 %v1574_v4  ;;  %v324_v39 = vpack.c.bf16 %v303_v37, %v302_v36  ;;  %v306_v42 = vld [vmem:[%s1754_s30 + $0xc0] sm:$0xff]  ;;  %v307_v43 = vld [vmem:[%s1754_s30 + $0xc8] sm:$0xff]  ;;  %v325_v44 = vpack.c.bf16 %v305_v41, %v304_v40  ;;  %v308_v46 = vld [vmem:[%s1754_s30 + $0xd0] sm:$0xff] }
  0x21   : > { %1514 = vmatprep.subr.bf16.mxu1 %v1575_v16  ;;  %v326_v45 = vpack.c.bf16 %v307_v43, %v306_v42  ;;  %v309_v47 = vld [vmem:[%s1754_s30 + $0xd8] sm:$0xff]  ;;  %v310_v48 = vld [vmem:[%s1754_s30 + $0xe0] sm:$0xff]  ;;  %v311_v49 = vld [vmem:[%s1754_s30 + $0xe8] sm:$0xff] }
  0x22   : > { %v327_v50 = vpack.c.bf16 %v309_v47, %v308_v46  ;;  %v328_v51 = vpack.c.bf16 %v311_v49, %v310_v48  ;;  %v312_v52 = vld [vmem:[%s1754_s30 + $0xf0] sm:$0xff]  ;;  %v313_v53 = vld [vmem:[%s1754_s30 + $0xf8] sm:$0xff]  ;;  %v1579_v57 = vld [vmem:[%s2108_s4] sm:$0xff]   ;;  %s843_s30 = sld [smem:[#allocation2]] }
  0x23   : > { %1466 = vmatpush3.bf16.msra.mxu0 %v1573_v3  ;;  %v329_v54 = vpack.c.bf16 %v313_v53, %v312_v52  ;;  %v1825_v60 = vld [vmem:[%s2107_s3] ss:$0 sm:$0xff] }
  0x24   : > { %1467 = vmatprep.subr.bf16.mxu0 %v1574_v4  ;;  %1522 = vmatpush3.bf16.msra.mxu1 %v1575_v16 }
  0x25   : > { %1515 = vmatprep.subr.bf16.mxu1 %v1576_v21 }
  0x26   : > { %1436 = vmatmul.mubr.msk.bf16.gmra.mxu0 %vm353_vm0, %v317_v19 }
  0x27   : > { %1439 = vmatprep.mubr.msk.bf16.mxu0 %vm353_vm0, %v318_v20  ;;  %1468 = vmatpush3.bf16.msra.mxu0 %v1574_v4 }
  0x28   : > { %1469 = vmatprep.subr.bf16.mxu0 %v1575_v16  ;;  %1523 = vmatpush3.bf16.msra.mxu1 %v1576_v21 }
  0x29   : > { %1516 = vmatprep.subr.bf16.mxu1 %v1577_v55 }
  0x2b   : > { %1470 = vmatpush3.bf16.msra.mxu0 %v1575_v16 }
  0x2c   : > { %1471 = vmatprep.subr.bf16.mxu0 %v1576_v21  ;;  %1524 = vmatpush3.bf16.msra.mxu1 %v1577_v55 }
  0x2d   : > { %1517 = vmatprep.subr.bf16.mxu1 %v1578_v56 }
  0x2e   : > { %1440 = vmatmul.mubr.msk.bf16.gmra.mxu0 %vm353_vm0, %v319_v26 }
  0x2f   : > { %1443 = vmatprep.mubr.msk.bf16.mxu0 %vm353_vm0, %v320_v27  ;;  %1472 = vmatpush3.bf16.msra.mxu0 %v1576_v21 }
  0x30   : > { %1473 = vmatprep.subr.bf16.mxu0 %v1577_v55  ;;  %1525 = vmatpush3.bf16.msra.mxu1 %v1578_v56 }
  0x31   : > { %1518 = vmatprep.subr.bf16.mxu1 %v1579_v57 }
  0x33   : > { %1474 = vmatpush3.bf16.msra.mxu0 %v1577_v55 }
  0x34   : > { %1475 = vmatprep.subr.bf16.mxu0 %v1578_v56  ;;  %1526 = vmatpush3.bf16.msra.mxu1 %v1579_v57 }
  0x36   : > { %1444 = vmatmul.mubr.msk.bf16.gmra.mxu0 %vm353_vm0, %v321_v32 }
  0x37   : > { %1447 = vmatprep.mubr.msk.bf16.mxu0 %vm353_vm0, %v322_v33  ;;  %1476 = vmatpush3.bf16.msra.mxu0 %v1578_v56 }
  0x38   : > { %1477 = vmatprep.subr.bf16.mxu0 %v1579_v57 }
  0x3b   : > { %1478 = vmatpush3.bf16.msra.mxu0 %v1579_v57 }
  0x3e   : > { %1448 = vmatmul.mubr.msk.bf16.gmra.mxu0 %vm353_vm0, %v323_v38 }
  0x3f   : > { %1451 = vmatprep.mubr.msk.bf16.mxu0 %vm353_vm0, %v324_v39 }
  0x46   : > { %1452 = vmatmul.mubr.msk.bf16.gmra.mxu0 %vm353_vm0, %v325_v44 }
  0x47   : > { %1455 = vmatprep.mubr.msk.bf16.mxu0 %vm353_vm0, %v326_v45 }
  0x4e   : > { %1456 = vmatmul.mubr.msk.bf16.gmra.mxu0 %vm353_vm0, %v327_v50 }
  0x4f   : > { %1459 = vmatprep.mubr.msk.bf16.mxu0 %vm353_vm0, %v328_v51 }
  0x56   : > { %1460 = vmatmul.mubr.msk.bf16.gmra.mxu0 %vm353_vm0, %v329_v54 }
  0xde   : > { %v1433_v58 = vpop.f32.mrf.mxu0 }
  0xdf   : > { %v445_v0 = vadd.f32 %v1433_v58, %v1825_v60 }
  0xe0   : > { %v436_v59 = vpop.f32.mrf.mxu0 }
  0xe1   : > { %v437_v62 = vadd.f32 %v1825_v60, %v436_v59  ;;  %v565_v7 = vmax.f32 %v445_v0, 0.0 }
  0xe2   : > { %v1434_v61 = vpop.f32.mrf.mxu0 }
  0xe3   : > { %v448_v63 = vadd.f32 %v1434_v61, %v1825_v60  ;;  %v563_v5 = vmax.f32 %v437_v62, 0.0 }
  0xe4   : > { %v439_v1 = vpop.f32.mrf.mxu0 }
  0xe5   : > { %v440_v2 = vadd.f32 %v1825_v60, %v439_v1  ;;  %v566_v3 = vmax.f32 %v448_v63, 0.0 }
  0xe6   : > { %v1437_v4 = vpop.f32.mrf.mxu0 }
  0xe7   : > { %v564_v6 = vmax.f32 %v440_v2, 0.0  ;;  %v596_v10 = vpack.c.bf16 %v566_v3, %v565_v7  ;;  %v461_v14 = vadd.f32 %v1437_v4, %v1825_v60 }
  0xe8   : > { %v452_v8 = vpop.f32.mrf.mxu0 }
  0xe9   : > { %v595_v9 = vpack.c.bf16 %v564_v6, %v563_v5  ;;  %v453_v12 = vadd.f32 %v1825_v60, %v452_v8  ;;  %v569_v21 = vmax.f32 %v461_v14, 0.0 }
  0xea   : > { %v1438_v11 = vpop.f32.mrf.mxu0 }
  0xeb   : > { %v464_v13 = vadd.f32 %v1438_v11, %v1825_v60  ;;  %1479 = vmatprep.mubr.bf16.mxu0 %v595_v9  ;;  %v567_v19 = vmax.f32 %v453_v12, 0.0 }
  0xec   : > { %v455_v15 = vpop.f32.mrf.mxu0  ;;  %1480 = vmatmul.mubr.bf16.vlgmr.msra.gmra.mxu0 %v596_v10 }
  0xed   : > { %v456_v16 = vadd.f32 %v1825_v60, %v455_v15  ;;  %v570_v17 = vmax.f32 %v464_v13, 0.0 }
  0xee   : > { %v1441_v18 = vpop.f32.mrf.mxu0 }
  0xef   : > { %v568_v20 = vmax.f32 %v456_v16, 0.0  ;;  %v598_v24 = vpack.c.bf16 %v570_v17, %v569_v21  ;;  %v477_v28 = vadd.f32 %v1441_v18, %v1825_v60 }
  0xf0   : > { %v468_v22 = vpop.f32.mrf.mxu0 }
  0xf1   : > { %v597_v23 = vpack.c.bf16 %v568_v20, %v567_v19  ;;  %v469_v26 = vadd.f32 %v1825_v60, %v468_v22  ;;  %v573_v35 = vmax.f32 %v477_v28, 0.0 }
  0xf2   : > { %v1442_v25 = vpop.f32.mrf.mxu0 }
  0xf3   : > { %v480_v27 = vadd.f32 %v1442_v25, %v1825_v60  ;;  %1483 = vmatprep.mubr.bf16.mxu1 %v597_v23  ;;  %v571_v33 = vmax.f32 %v469_v26, 0.0 }
  0xf4   : > { %v471_v29 = vpop.f32.mrf.mxu0  ;;  %1484 = vmatmul.mubr.bf16.vlgmr.msra.gmra.mxu1 %v598_v24 }
  0xf5   : > { %v472_v30 = vadd.f32 %v1825_v60, %v471_v29  ;;  %v574_v31 = vmax.f32 %v480_v27, 0.0 }
  0xf6   : > { %v1445_v32 = vpop.f32.mrf.mxu0 }
  0xf7   : > { %v572_v34 = vmax.f32 %v472_v30, 0.0  ;;  %v600_v38 = vpack.c.bf16 %v574_v31, %v573_v35  ;;  %v493_v42 = vadd.f32 %v1445_v32, %v1825_v60 }
  0xf8   : > { %v484_v36 = vpop.f32.mrf.mxu0 }
  0xf9   : > { %v599_v37 = vpack.c.bf16 %v572_v34, %v571_v33  ;;  %v485_v40 = vadd.f32 %v1825_v60, %v484_v36  ;;  %v577_v49 = vmax.f32 %v493_v42, 0.0 }
  0xfa   : > { %v1446_v39 = vpop.f32.mrf.mxu0 }
  0xfb   : > { %v496_v41 = vadd.f32 %v1446_v39, %v1825_v60  ;;  %1487 = vmatprep.mubr.bf16.mxu1 %v599_v37  ;;  %v575_v47 = vmax.f32 %v485_v40, 0.0 }
  0xfc   : > { %v487_v43 = vpop.f32.mrf.mxu0  ;;  %1488 = vmatmul.mubr.bf16.gmra.mxu1 %v600_v38 }
  0xfd   : > { %v488_v44 = vadd.f32 %v1825_v60, %v487_v43  ;;  %v578_v45 = vmax.f32 %v496_v41, 0.0 }
  0xfe   : > { %v1449_v46 = vpop.f32.mrf.mxu0 }
  0xff   : > { %v576_v48 = vmax.f32 %v488_v44, 0.0  ;;  %v602_v52 = vpack.c.bf16 %v578_v45, %v577_v49  ;;  %v509_v56 = vadd.f32 %v1449_v46, %v1825_v60  ;;  %v912_v44 = vlaneseq  ;;  %v909_v45 = vld [vmem:[%s2110_s6] sm:$0x1] }
 0x100   : > { %v500_v50 = vpop.f32.mrf.mxu0  ;;  %vm910_vm1 = vcmp.ne.f32.partialorder %v909_v45, 0.0 }
 0x101   : > { %v601_v51 = vpack.c.bf16 %v576_v48, %v575_v47  ;;  %v501_v54 = vadd.f32 %v1825_v60, %v500_v50  ;;  %v581_v0 = vmax.f32 %v509_v56, 0.0  ;;  %v913_v46 = vshrl.u32 %v912_v44, 7 }
 0x102   : > { %v1450_v53 = vpop.f32.mrf.mxu0  ;;  %v1642_v48 = vmov 0  }
 0x103   : > { %v512_v55 = vadd.f32 %v1450_v53, %v1825_v60  ;;  %1491 = vmatprep.mubr.bf16.mxu1 %v601_v51  ;;  %v579_v62 = vmax.f32 %v501_v54, 0.0  ;;  %v914_v47 = vsub.s32 0, %v913_v46  ;;  %v911_v49 = vsel %vm910_vm1, 1, %v1642_v48 }
 0x104   : > { %v503_v57 = vpop.f32.mrf.mxu0  ;;  %1492 = vmatmul.mubr.bf16.gmra.mxu1 %v602_v52  ;;  %v1867_v51 = vstv %s843_s30  ;;  %s1584_s30 = sshll.u32 %s1644_s25, 4  ;;  %s1585_s30 = int_to_ptr.vmem [resolvable:$false] %s1584_s30 }
 0x105   : > { %v504_v58 = vadd.f32 %v1825_v60, %v503_v57  ;;  %v582_v59 = vmax.f32 %v512_v55, 0.0  ;;  %v1870_v53 = vrot.slane %v911_v49, %v914_v47  ;;  %s1586_s9 = scalar_lea.vmem %s1585_s30, 4096  ;;  %p1587_p0 = scmp.lt.s32.totalorder %s2058_s20, %s1585_s30 }
 0x106   : > { %v1453_v61 = vpop.f32.mrf.mxu0  ;;  %p1588_p1 = scmp.lt.s32.totalorder %s1586_s9, %s1580_s24 }
 0x107   : > { %v580_v63 = vmax.f32 %v504_v58, 0.0  ;;  %v604_v3 = vpack.c.bf16 %v582_v59, %v581_v0  ;;  %v525_v7 = vadd.f32 %v1453_v61, %v1825_v60  ;;  %v1643_v58 = vmov 0.0  }
 0x108   : > { %v516_v1 = vpop.f32.mrf.mxu0  ;;  %vm916_vm4 = vcmp.eq.s32.totalorder %v1870_v53, 1  ;;  %p1589_p2 = por %p1588_p1, %p1587_p0 }
 0x109   : > { %v603_v2 = vpack.c.bf16 %v580_v63, %v579_v62  ;;  %v517_v5 = vadd.f32 %v1825_v60, %v516_v1  ;;  %v585_v14 = vmax.f32 %v525_v7, 0.0 }
 0x10a   : > { %v1454_v4 = vpop.f32.mrf.mxu0  ;;  %p1590_p3 = pnand %p1589_p2, %p1583_p13 }
 0x10b   : > { %v528_v6 = vadd.f32 %v1454_v4, %v1825_v60  ;;  %1495 = vmatprep.mubr.bf16.mxu1 %v603_v2  ;;  %v583_v12 = vmax.f32 %v517_v5, 0.0 }
 0x10c   : > { %v519_v8 = vpop.f32.mrf.mxu0  ;;  %1496 = vmatmul.mubr.bf16.gmra.mxu1 %v604_v3 }
 0x10d   : > { %v520_v9 = vadd.f32 %v1825_v60, %v519_v8  ;;  %v586_v10 = vmax.f32 %v528_v6, 0.0 }
 0x10e   : > { %v1457_v11 = vpop.f32.mrf.mxu0 }
 0x10f   : > { %v584_v13 = vmax.f32 %v520_v9, 0.0  ;;  %v606_v17 = vpack.c.bf16 %v586_v10, %v585_v14  ;;  %v541_v21 = vadd.f32 %v1457_v11, %v1825_v60 }
 0x110   : > { %v532_v15 = vpop.f32.mrf.mxu0 }
 0x111   : > { %v605_v16 = vpack.c.bf16 %v584_v13, %v583_v12  ;;  %v533_v19 = vadd.f32 %v1825_v60, %v532_v15  ;;  %v589_v28 = vmax.f32 %v541_v21, 0.0 }
 0x112   : > { %v1458_v18 = vpop.f32.mrf.mxu0 }
 0x113   : > { %v544_v20 = vadd.f32 %v1458_v18, %v1825_v60  ;;  %1499 = vmatprep.mubr.bf16.mxu1 %v605_v16  ;;  %v587_v26 = vmax.f32 %v533_v19, 0.0 }
 0x114   : > { %v535_v22 = vpop.f32.mrf.mxu0  ;;  %1500 = vmatmul.mubr.bf16.gmra.mxu1 %v606_v17 }
 0x115   : > { %v536_v23 = vadd.f32 %v1825_v60, %v535_v22  ;;  %v590_v24 = vmax.f32 %v544_v20, 0.0 }
 0x116   : > { %v1461_v25 = vpop.f32.mrf.mxu0 }
 0x117   : > { %v588_v27 = vmax.f32 %v536_v23, 0.0  ;;  %v608_v31 = vpack.c.bf16 %v590_v24, %v589_v28  ;;  %v557_v35 = vadd.f32 %v1461_v25, %v1825_v60 }
 0x118   : > { %v548_v29 = vpop.f32.mrf.mxu0 }
 0x119   : > { %v607_v30 = vpack.c.bf16 %v588_v27, %v587_v26  ;;  %v549_v33 = vadd.f32 %v1825_v60, %v548_v29  ;;  %v593_v41 = vmax.f32 %v557_v35, 0.0 }
 0x11a   : > { %v1462_v32 = vpop.f32.mrf.mxu0 }
 0x11b   : > { %v560_v34 = vadd.f32 %v1462_v32, %v1825_v60  ;;  %1503 = vmatprep.mubr.bf16.mxu1 %v607_v30  ;;  %v591_v39 = vmax.f32 %v549_v33, 0.0 }
 0x11c   : > { %v551_v36 = vpop.f32.mrf.mxu0  ;;  %1504 = vmatmul.mubr.bf16.gmra.mxu1 %v608_v31 }
 0x11d   : > { %v552_v37 = vadd.f32 %v1825_v60, %v551_v36  ;;  %v594_v38 = vmax.f32 %v560_v34, 0.0  ;;  %v1865_v60 = vld [vmem:[%s2109_s5] ss:$0 sm:$0xff] }
 0x11f   : > { %v592_v40 = vmax.f32 %v552_v37, 0.0  ;;  %v610_v43 = vpack.c.bf16 %v594_v38, %v593_v41 }
 0x121   : > { %v609_v42 = vpack.c.bf16 %v592_v40, %v591_v39 }
 0x123   : > { %1507 = vmatprep.mubr.bf16.mxu1 %v609_v42 }
 0x124   : > { %1508 = vmatmul.mubr.bf16.gmra.mxu1 %v610_v43 }
 0x1ac   : > { %v1481_v50 = vpop.f32.mrf.mxu0 }
 0x1ad   : > { %v725_v52 = vadd.f32 %v1481_v50, %v1865_v60 }
 0x1ae   : > { %v716_v54 = vpop.f32.mrf.mxu0 }
 0x1af   : > { %vm847_vm2 = vcmp.gt.f32.partialorder %v725_v52, %v1867_v51  ;;  %v717_v55 = vadd.f32 %v1865_v60, %v716_v54 }
 0x1b0   : > { %v1482_v56 = vpop.f32.mrf.mxu0  ;;  %v879_v59 = vsel %vm847_vm2, 1.0, %v1643_v58 }
 0x1b1   : > { %vm845_vm3 = vcmp.gt.f32.partialorder %v717_v55, %v1867_v51  ;;  %v728_v57 = vadd.f32 %v1482_v56, %v1865_v60  ;;  %v919_v2 = vsel %vm916_vm4, %v879_v59, %v725_v52 }
 0x1b2   : > { %v719_v61 = vpop.f32.mrf.mxu0  ;;  %v877_v63 = vsel %vm845_vm3, 1.0, %v1643_v58 }
 0x1b3   : > { %vm848_vm5 = vcmp.gt.f32.partialorder %v728_v57, %v1867_v51  ;;  %v720_v62 = vadd.f32 %v1865_v60, %v719_v61  ;;  %v917_v8 = vsel %vm916_vm4, %v877_v63, %v717_v55 }
 0x1b4   : > { %v880_v0 = vsel %vm848_vm5, 1.0, %v1643_v58  ;;  %v1485_v1 = vpop.f32.mrf.mxu1 }
 0x1b5   : > { %v920_v3 = vsel %vm916_vm4, %v880_v0, %v728_v57  ;;  %vm846_vm6 = vcmp.gt.f32.partialorder %v720_v62, %v1867_v51  ;;  %v741_v4 = vadd.f32 %v1485_v1, %v1865_v60 }
 0x1b6   : > { %v1298_v5 = vpack.c.bf16 %v920_v3, %v919_v2  ;;  %v878_v6 = vsel %vm846_vm6, 1.0, %v1643_v58  ;;  %v732_v7 = vpop.f32.mrf.mxu1 }
 0x1b7   : > { %v918_v9 = vsel %vm916_vm4, %v878_v6, %v720_v62  ;;  %vm851_vm7 = vcmp.gt.f32.partialorder %v741_v4, %v1867_v51  ;;  %v733_v10 = vadd.f32 %v1865_v60, %v732_v7 }
 0x1b8   : > { %1370 = vst [vmem:[%s1898_s18 + $0x8] sm:$0xff] %v1298_v5   ;;  %v1293_v11 = vpack.c.bf16 %v918_v9, %v917_v8  ;;  %v1486_v12 = vpop.f32.mrf.mxu1  ;;  %v883_v14 = vsel %vm851_vm7, 1.0, %v1643_v58 }
 0x1b9   : > { %vm849_vm8 = vcmp.gt.f32.partialorder %v733_v10, %v1867_v51  ;;  %v744_v13 = vadd.f32 %v1486_v12, %v1865_v60  ;;  %v923_v20 = vsel %vm916_vm4, %v883_v14, %v741_v4 }
 0x1ba   : > { %1294 = vst [vmem:[%s1898_s18] sm:$0xff] %v1293_v11   ;;  %v735_v15 = vpop.f32.mrf.mxu1  ;;  %v881_v17 = vsel %vm849_vm8, 1.0, %v1643_v58 }
 0x1bb   : > { %vm852_vm9 = vcmp.gt.f32.partialorder %v744_v13, %v1867_v51  ;;  %v736_v16 = vadd.f32 %v1865_v60, %v735_v15  ;;  %v921_v26 = vsel %vm916_vm4, %v881_v17, %v733_v10 }
 0x1bc   : > { %v884_v18 = vsel %vm852_vm9, 1.0, %v1643_v58  ;;  %v1489_v19 = vpop.f32.mrf.mxu1 }
 0x1bd   : > { %v924_v21 = vsel %vm916_vm4, %v884_v18, %v744_v13  ;;  %vm850_vm10 = vcmp.gt.f32.partialorder %v736_v16, %v1867_v51  ;;  %v757_v22 = vadd.f32 %v1489_v19, %v1865_v60 }
 0x1be   : > { %v1308_v23 = vpack.c.bf16 %v924_v21, %v923_v20  ;;  %v882_v24 = vsel %vm850_vm10, 1.0, %v1643_v58  ;;  %v748_v25 = vpop.f32.mrf.mxu1 }
 0x1bf   : > { %v922_v27 = vsel %vm916_vm4, %v882_v24, %v736_v16  ;;  %vm855_vm11 = vcmp.gt.f32.partialorder %v757_v22, %v1867_v51  ;;  %v749_v28 = vadd.f32 %v1865_v60, %v748_v25 }
 0x1c0   : > { %1372 = vst [vmem:[%s1898_s18 + $0x18] sm:$0xff] %v1308_v23   ;;  %v1303_v29 = vpack.c.bf16 %v922_v27, %v921_v26  ;;  %v1490_v30 = vpop.f32.mrf.mxu1  ;;  %v887_v32 = vsel %vm855_vm11, 1.0, %v1643_v58 }
 0x1c1   : > { %vm853_vm12 = vcmp.gt.f32.partialorder %v749_v28, %v1867_v51  ;;  %v760_v31 = vadd.f32 %v1490_v30, %v1865_v60  ;;  %v927_v38 = vsel %vm916_vm4, %v887_v32, %v757_v22 }
 0x1c2   : > { %1371 = vst [vmem:[%s1898_s18 + $0x10] sm:$0xff] %v1303_v29   ;;  %v751_v33 = vpop.f32.mrf.mxu1  ;;  %v885_v35 = vsel %vm853_vm12, 1.0, %v1643_v58 }
 0x1c3   : > { %vm856_vm13 = vcmp.gt.f32.partialorder %v760_v31, %v1867_v51  ;;  %v752_v34 = vadd.f32 %v1865_v60, %v751_v33  ;;  %v925_v44 = vsel %vm916_vm4, %v885_v35, %v749_v28 }
 0x1c4   : > { %v888_v36 = vsel %vm856_vm13, 1.0, %v1643_v58  ;;  %v1493_v37 = vpop.f32.mrf.mxu1 }
 0x1c5   : > { %v928_v39 = vsel %vm916_vm4, %v888_v36, %v760_v31  ;;  %vm854_vm14 = vcmp.gt.f32.partialorder %v752_v34, %v1867_v51  ;;  %v773_v40 = vadd.f32 %v1493_v37, %v1865_v60 }
 0x1c6   : > { %v1318_v41 = vpack.c.bf16 %v928_v39, %v927_v38  ;;  %v886_v42 = vsel %vm854_vm14, 1.0, %v1643_v58  ;;  %v764_v43 = vpop.f32.mrf.mxu1 }
 0x1c7   : > { %v926_v45 = vsel %vm916_vm4, %v886_v42, %v752_v34  ;;  %vm859_vm15 = vcmp.gt.f32.partialorder %v773_v40, %v1867_v51  ;;  %v765_v46 = vadd.f32 %v1865_v60, %v764_v43 }
 0x1c8   : > { %1374 = vst [vmem:[%s1898_s18 + $0x28] sm:$0xff] %v1318_v41   ;;  %v1313_v47 = vpack.c.bf16 %v926_v45, %v925_v44  ;;  %v1494_v48 = vpop.f32.mrf.mxu1  ;;  %v891_v50 = vsel %vm859_vm15, 1.0, %v1643_v58 }
 0x1c9   : > { %vm857_vm0 = vcmp.gt.f32.partialorder %v765_v46, %v1867_v51  ;;  %v776_v49 = vadd.f32 %v1494_v48, %v1865_v60  ;;  %v931_v59 = vsel %vm916_vm4, %v891_v50, %v773_v40 }
 0x1ca   : > { %1373 = vst [vmem:[%s1898_s18 + $0x20] sm:$0xff] %v1313_v47   ;;  %v767_v52 = vpop.f32.mrf.mxu1  ;;  %v889_v55 = vsel %vm857_vm0, 1.0, %v1643_v58 }
 0x1cb   : > { %vm860_vm1 = vcmp.gt.f32.partialorder %v776_v49, %v1867_v51  ;;  %v768_v54 = vadd.f32 %v1865_v60, %v767_v52  ;;  %v929_v2 = vsel %vm916_vm4, %v889_v55, %v765_v46 }
 0x1cc   : > { %v892_v56 = vsel %vm860_vm1, 1.0, %v1643_v58  ;;  %v1497_v57 = vpop.f32.mrf.mxu1 }
 0x1cd   : > { %v932_v61 = vsel %vm916_vm4, %v892_v56, %v776_v49  ;;  %vm858_vm2 = vcmp.gt.f32.partialorder %v768_v54, %v1867_v51  ;;  %v789_v62 = vadd.f32 %v1497_v57, %v1865_v60 }
 0x1ce   : > { %v1328_v63 = vpack.c.bf16 %v932_v61, %v931_v59  ;;  %v890_v0 = vsel %vm858_vm2, 1.0, %v1643_v58  ;;  %v780_v1 = vpop.f32.mrf.mxu1 }
 0x1cf   : > { %v930_v3 = vsel %vm916_vm4, %v890_v0, %v768_v54  ;;  %vm863_vm3 = vcmp.gt.f32.partialorder %v789_v62, %v1867_v51  ;;  %v781_v4 = vadd.f32 %v1865_v60, %v780_v1 }
 0x1d0   : > { %1376 = vst [vmem:[%s1898_s18 + $0x38] sm:$0xff] %v1328_v63   ;;  %v1323_v5 = vpack.c.bf16 %v930_v3, %v929_v2  ;;  %v1498_v6 = vpop.f32.mrf.mxu1  ;;  %v895_v8 = vsel %vm863_vm3, 1.0, %v1643_v58 }
 0x1d1   : > { %vm861_vm5 = vcmp.gt.f32.partialorder %v781_v4, %v1867_v51  ;;  %v792_v7 = vadd.f32 %v1498_v6, %v1865_v60  ;;  %v935_v14 = vsel %vm916_vm4, %v895_v8, %v789_v62 }
 0x1d2   : > { %1375 = vst [vmem:[%s1898_s18 + $0x30] sm:$0xff] %v1323_v5   ;;  %v783_v9 = vpop.f32.mrf.mxu1  ;;  %v893_v11 = vsel %vm861_vm5, 1.0, %v1643_v58 }
 0x1d3   : > { %vm864_vm6 = vcmp.gt.f32.partialorder %v792_v7, %v1867_v51  ;;  %v784_v10 = vadd.f32 %v1865_v60, %v783_v9  ;;  %v933_v20 = vsel %vm916_vm4, %v893_v11, %v781_v4 }
 0x1d4   : > { %v896_v12 = vsel %vm864_vm6, 1.0, %v1643_v58  ;;  %v1501_v13 = vpop.f32.mrf.mxu1 }
 0x1d5   : > { %v936_v15 = vsel %vm916_vm4, %v896_v12, %v792_v7  ;;  %vm862_vm7 = vcmp.gt.f32.partialorder %v784_v10, %v1867_v51  ;;  %v805_v16 = vadd.f32 %v1501_v13, %v1865_v60 }
 0x1d6   : > { %v1338_v17 = vpack.c.bf16 %v936_v15, %v935_v14  ;;  %v894_v18 = vsel %vm862_vm7, 1.0, %v1643_v58  ;;  %v796_v19 = vpop.f32.mrf.mxu1 }
 0x1d7   : > { %v934_v21 = vsel %vm916_vm4, %v894_v18, %v784_v10  ;;  %vm867_vm8 = vcmp.gt.f32.partialorder %v805_v16, %v1867_v51  ;;  %v797_v22 = vadd.f32 %v1865_v60, %v796_v19 }
 0x1d8   : > { %1378 = vst [vmem:[%s1898_s18 + $0x48] sm:$0xff] %v1338_v17   ;;  %v1333_v23 = vpack.c.bf16 %v934_v21, %v933_v20  ;;  %v1502_v24 = vpop.f32.mrf.mxu1  ;;  %v899_v26 = vsel %vm867_vm8, 1.0, %v1643_v58 }
 0x1d9   : > { %vm865_vm9 = vcmp.gt.f32.partialorder %v797_v22, %v1867_v51  ;;  %v808_v25 = vadd.f32 %v1502_v24, %v1865_v60  ;;  %v939_v32 = vsel %vm916_vm4, %v899_v26, %v805_v16 }
 0x1da   : > { %1377 = vst [vmem:[%s1898_s18 + $0x40] sm:$0xff] %v1333_v23   ;;  %v799_v27 = vpop.f32.mrf.mxu1  ;;  %v897_v29 = vsel %vm865_vm9, 1.0, %v1643_v58 }
 0x1db   : > { %vm868_vm10 = vcmp.gt.f32.partialorder %v808_v25, %v1867_v51  ;;  %v800_v28 = vadd.f32 %v1865_v60, %v799_v27  ;;  %v937_v38 = vsel %vm916_vm4, %v897_v29, %v797_v22 }
 0x1dc   : > { %v900_v30 = vsel %vm868_vm10, 1.0, %v1643_v58  ;;  %v1505_v31 = vpop.f32.mrf.mxu1 }
 0x1dd   : > { %v940_v33 = vsel %vm916_vm4, %v900_v30, %v808_v25  ;;  %vm866_vm11 = vcmp.gt.f32.partialorder %v800_v28, %v1867_v51  ;;  %v821_v34 = vadd.f32 %v1505_v31, %v1865_v60 }
 0x1de   : > { %v1348_v35 = vpack.c.bf16 %v940_v33, %v939_v32  ;;  %v898_v36 = vsel %vm866_vm11, 1.0, %v1643_v58  ;;  %v812_v37 = vpop.f32.mrf.mxu1 }
 0x1df   : > { %v938_v39 = vsel %vm916_vm4, %v898_v36, %v800_v28  ;;  %vm871_vm12 = vcmp.gt.f32.partialorder %v821_v34, %v1867_v51  ;;  %v813_v40 = vadd.f32 %v1865_v60, %v812_v37 }
 0x1e0   : > { %1380 = vst [vmem:[%s1898_s18 + $0x58] sm:$0xff] %v1348_v35   ;;  %v1343_v41 = vpack.c.bf16 %v938_v39, %v937_v38  ;;  %v1506_v42 = vpop.f32.mrf.mxu1  ;;  %v903_v44 = vsel %vm871_vm12, 1.0, %v1643_v58 }
 0x1e1   : > { %vm869_vm13 = vcmp.gt.f32.partialorder %v813_v40, %v1867_v51  ;;  %v824_v43 = vadd.f32 %v1506_v42, %v1865_v60  ;;  %v943_v50 = vsel %vm916_vm4, %v903_v44, %v821_v34 }
 0x1e2   : > { %1379 = vst [vmem:[%s1898_s18 + $0x50] sm:$0xff] %v1343_v41   ;;  %v815_v45 = vpop.f32.mrf.mxu1  ;;  %v901_v47 = vsel %vm869_vm13, 1.0, %v1643_v58 }
 0x1e3   : > { %vm872_vm14 = vcmp.gt.f32.partialorder %v824_v43, %v1867_v51  ;;  %v816_v46 = vadd.f32 %v1865_v60, %v815_v45  ;;  %v941_v59 = vsel %vm916_vm4, %v901_v47, %v813_v40 }
 0x1e4   : > { %v904_v48 = vsel %vm872_vm14, 1.0, %v1643_v58  ;;  %v1509_v49 = vpop.f32.mrf.mxu1 }
 0x1e5   : > { %v944_v52 = vsel %vm916_vm4, %v904_v48, %v824_v43  ;;  %vm870_vm15 = vcmp.gt.f32.partialorder %v816_v46, %v1867_v51  ;;  %v837_v54 = vadd.f32 %v1509_v49, %v1865_v60 }
 0x1e6   : > { %v1358_v55 = vpack.c.bf16 %v944_v52, %v943_v50  ;;  %v902_v56 = vsel %vm870_vm15, 1.0, %v1643_v58  ;;  %v828_v57 = vpop.f32.mrf.mxu1 }
 0x1e7   : > { %v942_v61 = vsel %vm916_vm4, %v902_v56, %v816_v46  ;;  %vm875_vm0 = vcmp.gt.f32.partialorder %v837_v54, %v1867_v51  ;;  %v829_v62 = vadd.f32 %v1865_v60, %v828_v57 }
 0x1e8   : > { %1382 = vst [vmem:[%s1898_s18 + $0x68] sm:$0xff] %v1358_v55   ;;  %v1353_v63 = vpack.c.bf16 %v942_v61, %v941_v59  ;;  %v1510_v0 = vpop.f32.mrf.mxu1  ;;  %v907_v2 = vsel %vm875_vm0, 1.0, %v1643_v58 }
 0x1e9   : > { %vm873_vm1 = vcmp.gt.f32.partialorder %v829_v62, %v1867_v51  ;;  %v840_v1 = vadd.f32 %v1510_v0, %v1865_v60  ;;  %v947_v7 = vsel %vm916_vm4, %v907_v2, %v837_v54 }
 0x1ea   : > { %1381 = vst [vmem:[%s1898_s18 + $0x60] sm:$0xff] %v1353_v63   ;;  %v831_v3 = vpop.f32.mrf.mxu1  ;;  %v905_v5 = vsel %vm873_vm1, 1.0, %v1643_v58 }
 0x1eb   : > { %vm876_vm2 = vcmp.gt.f32.partialorder %v840_v1, %v1867_v51  ;;  %v832_v4 = vadd.f32 %v1865_v60, %v831_v3  ;;  %v945_v10 = vsel %vm916_vm4, %v905_v5, %v829_v62 }
 0x1ec   : > { %v908_v6 = vsel %vm876_vm2, 1.0, %v1643_v58 }
 0x1ed   : > { %v948_v8 = vsel %vm916_vm4, %v908_v6, %v840_v1  ;;  %vm874_vm3 = vcmp.gt.f32.partialorder %v832_v4, %v1867_v51 }
 0x1ee   : > { %v1368_v9 = vpack.c.bf16 %v948_v8, %v947_v7  ;;  %v906_v60 = vsel %vm874_vm3, 1.0, %v1643_v58 }
 0x1ef   : > { %v946_v11 = vsel %vm916_vm4, %v906_v60, %v832_v4 }
 0x1f0   : > { %1384 = vst [vmem:[%s1898_s18 + $0x78] sm:$0xff] %v1368_v9   ;;  %v1363_v51 = vpack.c.bf16 %v946_v11, %v945_v10 }
 0x1f2   : > { %1383 = vst [vmem:[%s1898_s18 + $0x70] sm:$0xff] %v1363_v51  }
 0x1f3   : > { %1593 = shalt.err (!%p1590_p3)
}
 0x1f4   : > { %s1594_s10 = scalar_lea.hbm %s2056_s22, 2048  ;;  %s1598_s16 = scalar_lea.hbm %s2111_s7, 4096 }
 0x1f5   : > { %p1595_p4 = scmp.ne.s32.totalorder %s2056_s22, %s1594_s10  ;;  %p1599_p9 = scmp.lt.s32.totalorder %s2056_s22, %s2111_s7 }
 0x1f6   : > { %p1600_p10 = scmp.lt.s32.totalorder %s1598_s16, %s1594_s10 }
 0x1f7   : > { %p1596_p7 = pnand %p1595_p4, %p1728_p5 }
 0x1f8   : > { %p1601_p11 = por %p1600_p10, %p1599_p9 }
 0x1f9   : > { %p1597_p8 = pneg %p1596_p7 }
 0x1fb   : > { %p1602_p12 = pnand %p1601_p11, %p1597_p8 }
 0x1fd   : > { %1605 = shalt.err (!%p1602_p12)
}
 0x1fe   : > { %s1645_s19 = smov 64   ;;  %s1646_s0 = smov 4  }
 0x1ff   : > { %1527 = dma.vmem_to_hbm [thread:$0]  (%p1728_p5), %s2058_s20, 2048, %s2056_s22, %s2064_s23, %s1645_s19, %s1645_s19, %s1646_s0  }
 0x200 PF: > { %p1533_p13 = scmp.ge.s32.totalorder %s1640_s29, 2  ;;  %s1138_s21 = sand.u32 1, %s1628_s26  }
 0x201   : > { %s1139_s24 = scalar_lea.sflag [#allocation4], %s1138_s21 }
 0x202   : > { %p1530_p0 = pnand %p1533_p13, %p1732_p6 }
 0x204   : > { %p1531_p1 = pneg %p1530_p0 }
 0x206   : > { %1623 = dma.done.wait (%p1531_p1), %s1139_s24, 2048  }
 0x207   : > { %1625 = vsyncadd (%p1531_p1), %s1139_s24, 4294965248  ;;  %p18_p2 = scmp.ge.s32.totalorder %s1715_s8, 4   ;;  %s2114_s26 = smov %s1632_s27 }
 0x208   : > { %s2115_s27 = smov %s1636_s28  ;;  %s2116_s28 = smov %s1726_s11 }
 0x209   : > { %s2117_s29 = smov %s1715_s8  ;;  %20 = sbr.rel (!%p18_p2) target bundleno = 5 (0x5), region = 83 }
 0x20e   :  { %1144 = vsyncpa [#allocation4], 1 }
 0x20f   :  { %1146 = vsyncpa [#allocation4 + $0x1], 1 }

</bundles_post_ra>
